<compile_context>
chip_gen: v6e
topology: v6e:2x2x1
jax: 0.10.0
libtpu: 0.0.40
codegen_flags: <defaults>
</compile_context>

<pallas_src>
import functools
import math

import jax
import jax.numpy as jnp
from jax.experimental import pallas as pl
from jax.experimental.pallas import tpu as pltpu


def pnca_angle_kernel(x_ref, p_ref, t_ref, loss_ref, *, alpha):
    x = x_ref[...].astype(jnp.float32)   # (tN, E) embeddings
    p = p_ref[...].astype(jnp.float32)   # (C,  E) proxies
    t = t_ref[...]                       # (tN, 1) int32 labels

    # L2 normalize (torch F.normalize eps=1e-12 on the norm -> eps^2 on sumsq).
    eps2 = jnp.float32(1e-24)
    x_inv = jax.lax.rsqrt(jnp.maximum(jnp.sum(x * x, axis=-1, keepdims=True), eps2))
    p_inv = jax.lax.rsqrt(jnp.maximum(jnp.sum(p * p, axis=-1, keepdims=True), eps2))
    xn = x * x_inv                       # unit rows
    pn = p * p_inv

    # cos[i, j] = <xn_i, pn_j>  (single MXU matmul)
    cos = jax.lax.dot_general(
        xn, pn, (((1,), (1,)), ((), ())),
        preferred_element_type=jnp.float32)                       # (tN, C)

    # s = -D with D = clamp(2*alpha^2*(1 - cos), min=0); clamp only trims fp error.
    two_a2 = jnp.float32(2.0 * alpha * alpha)
    s = jnp.minimum(two_a2 * cos - two_a2, 0.0)                   # (tN, C), <= 0

    tn, c = s.shape
    label_mask = jax.lax.broadcasted_iota(jnp.int32, (tn, c), 1) == t  # (tN, C)

    # log(loss1) = s_label  (one-hot labels, smoothing_const=0)
    s_label = jnp.sum(jnp.where(label_mask, s, 0.0), axis=-1, keepdims=True)

    # log(loss2) = logsumexp over non-label classes (stable for any alpha).
    neg_inf = jnp.float32(-jnp.inf)
    s_rest = jnp.where(label_mask, neg_inf, s)
    m = jnp.max(s_rest, axis=-1, keepdims=True)
    sum_e = jnp.sum(jnp.exp(s_rest - m), axis=-1, keepdims=True)
    log_loss2 = m + jnp.log(sum_e)

    # loss_i = -log(loss1 / loss2) = log(loss2) - log(loss1)
    loss_ref[...] = log_loss2 - s_label


def _round_up(x, m):
    return (x + m - 1) // m * m


def pnca_loss_angle(X, T, P, alpha=32.0, block_n=128):
    """Forward pass of PNCALoss_Angle. X:(N,E) f32, T:(N,) int, P:(C,E) f32 -> scalar f32."""
    X = X.astype(jnp.float32)
    P = P.astype(jnp.float32)
    N, E = X.shape
    C = P.shape[0]

    # Pad batch to a sublane multiple and pick an N-tile that divides it.
    n_pad = _round_up(N, 8)
    tn = min(block_n, n_pad)
    n_pad = _round_up(n_pad, tn)
    if n_pad != N:
        X = jnp.pad(X, ((0, n_pad - N), (0, 0)))
        T = jnp.pad(T, ((0, n_pad - N),))
    t2d = T.astype(jnp.int32).reshape(n_pad, 1)

    kernel = functools.partial(pnca_angle_kernel, alpha=float(alpha))
    per_row = pl.pallas_call(
        kernel,
        out_shape=jax.ShapeDtypeStruct((n_pad, 1), jnp.float32),
        grid=(n_pad // tn,),
        in_specs=[
            pl.BlockSpec((tn, E), lambda i: (i, 0)),   # X tile
            pl.BlockSpec((C, E), lambda i: (0, 0)),    # all proxies each step
            pl.BlockSpec((tn, 1), lambda i: (i, 0)),   # int labels tile
        ],
        out_specs=pl.BlockSpec((tn, 1), lambda i: (i, 0)),
        compiler_params=pltpu.CompilerParams(
            dimension_semantics=("parallel",)),
    )(X, P, t2d)

    # Mean over the real (unpadded) rows.
    return jnp.mean(per_row[:N, 0])


if __name__ == "__main__":
    # Small, deterministic setup consistent with the module:
    #   nb_classes=8, sz_embed=32, batch N=8, alpha=32 (module default —
    #   handled stably thanks to the log-domain formulation).
    nb_classes = 8
    sz_embed = 32
    batch = 8
    alpha = 32.0

    key = jax.random.PRNGKey(0)
    kx, kp, kt = jax.random.split(key, 3)

    # Embeddings X (N, E)
    X = jax.random.normal(kx, (batch, sz_embed), dtype=jnp.float32)
    # Integer labels T (N,)
    T = jax.random.randint(kt, (batch,), 0, nb_classes, dtype=jnp.int32)
    # Proxies: kaiming_normal_ with mode='fan_out' on (nb_classes, sz_embed)
    # -> std = sqrt(2 / nb_classes); deterministic synthetic init.
    proxies = jax.random.normal(kp, (nb_classes, sz_embed), dtype=jnp.float32) * math.sqrt(
        2.0 / nb_classes
    )

    loss = pnca_loss_angle(X, T, proxies, alpha=alpha)
    jax.block_until_ready(loss)
    print("KERNEL_OK")
</pallas_src>

<mosaic_0001>
module attributes {stable_mosaic.version = 11 : i64} {
  func.func @pnca_angle_kernel(%arg0: i32, %arg1: memref<8x32xf32, #tpu.memory_space<vmem>>, %arg2: memref<8x32xf32, #tpu.memory_space<vmem>>, %arg3: memref<8x1xi32, #tpu.memory_space<vmem>>, %arg4: memref<8x1xf32, #tpu.memory_space<vmem>>) attributes {dimension_semantics = [#tpu.dimension_semantics<parallel>], iteration_bounds = array<i64: 1>, scalar_prefetch = 0 : i64, scratch_operands = 0 : i64, tpu.core_type = #tpu.core_type<tc>, window_params = [{transform_indices = @transform_0, window_bounds = array<i64: 8, 32>}, {pipeline_mode = #tpu.pipeline_mode<synchronous>, transform_indices = @transform_1, window_bounds = array<i64: 8, 32>}, {transform_indices = @transform_2, window_bounds = array<i64: 8, 1>}, {transform_indices = @transform_3, window_bounds = array<i64: 8, 1>}]} {
    %c0 = arith.constant 0 : index
    %c0_0 = arith.constant 0 : index
    %0 = vector.load %arg1[%c0, %c0_0] : memref<8x32xf32, #tpu.memory_space<vmem>>, vector<8x32xf32>
    %c0_1 = arith.constant 0 : index
    %c0_2 = arith.constant 0 : index
    %1 = vector.load %arg2[%c0_1, %c0_2] : memref<8x32xf32, #tpu.memory_space<vmem>>, vector<8x32xf32>
    %c0_3 = arith.constant 0 : index
    %c0_4 = arith.constant 0 : index
    %2 = vector.load %arg3[%c0_3, %c0_4] : memref<8x1xi32, #tpu.memory_space<vmem>>, vector<8x1xi32>
    %3 = arith.mulf %0, %0 : vector<8x32xf32>
    %cst = arith.constant dense<0.000000e+00> : vector<8xf32>
    %4 = vector.multi_reduction <add>, %3, %cst [1] : vector<8x32xf32> to vector<8xf32>
    %5 = vector.shape_cast %4 : vector<8xf32> to vector<8x1xf32>
    %cst_5 = arith.constant 1.000000e-24 : f32
    %6 = vector.broadcast %cst_5 : f32 to vector<8x1xf32>
    %7 = arith.maximumf %5, %6 : vector<8x1xf32>
    %8 = math.rsqrt %7 : vector<8x1xf32>
    %9 = arith.mulf %1, %1 : vector<8x32xf32>
    %cst_6 = arith.constant dense<0.000000e+00> : vector<8xf32>
    %10 = vector.multi_reduction <add>, %9, %cst_6 [1] : vector<8x32xf32> to vector<8xf32>
    %11 = vector.shape_cast %10 : vector<8xf32> to vector<8x1xf32>
    %cst_7 = arith.constant 1.000000e-24 : f32
    %12 = vector.broadcast %cst_7 : f32 to vector<8x1xf32>
    %13 = arith.maximumf %11, %12 : vector<8x1xf32>
    %14 = math.rsqrt %13 : vector<8x1xf32>
    %15 = vector.broadcast %8 : vector<8x1xf32> to vector<8x32xf32>
    %16 = arith.mulf %0, %15 : vector<8x32xf32>
    %17 = vector.broadcast %14 : vector<8x1xf32> to vector<8x32xf32>
    %18 = arith.mulf %1, %17 : vector<8x32xf32>
    %cst_8 = arith.constant dense<0.000000e+00> : vector<8x8xf32>
    %19 = tpu.matmul %16, %18, %cst_8 {dimension_numbers = #tpu.dot_dimension_numbers<[1], [1], [0], [0], [0, 0, 1, 0], [], []>} : vector<8x32xf32>, vector<8x32xf32>, vector<8x8xf32> -> vector<8x8xf32>
    %cst_9 = arith.constant 2.048000e+03 : f32
    %20 = vector.broadcast %cst_9 : f32 to vector<8x8xf32>
    %21 = arith.mulf %20, %19 : vector<8x8xf32>
    %cst_10 = arith.constant 2.048000e+03 : f32
    %22 = vector.broadcast %cst_10 : f32 to vector<8x8xf32>
    %23 = arith.subf %21, %22 : vector<8x8xf32>
    %cst_11 = arith.constant 0.000000e+00 : f32
    %24 = vector.broadcast %cst_11 : f32 to vector<8x8xf32>
    %25 = arith.minimumf %23, %24 : vector<8x8xf32>
    %26 = tpu.iota {dimensions = array<i32: 1>} : vector<8x8xi32>
    %27 = vector.broadcast %2 : vector<8x1xi32> to vector<8x8xi32>
    %28 = arith.cmpi eq, %26, %27 : vector<8x8xi32>
    %cst_12 = arith.constant 0.000000e+00 : f32
    %29 = vector.broadcast %cst_12 : f32 to vector<8x8xf32>
    %30 = arith.select %28, %25, %29 : vector<8x8xi1>, vector<8x8xf32>
    %cst_13 = arith.constant dense<0.000000e+00> : vector<8xf32>
    %31 = vector.multi_reduction <add>, %30, %cst_13 [1] : vector<8x8xf32> to vector<8xf32>
    %32 = vector.shape_cast %31 : vector<8xf32> to vector<8x1xf32>
    %cst_14 = arith.constant 0xFF800000 : f32
    %33 = vector.broadcast %cst_14 : f32 to vector<8x8xf32>
    %34 = arith.select %28, %33, %25 : vector<8x8xi1>, vector<8x8xf32>
    %cst_15 = arith.constant dense<0xFF800000> : vector<8xf32>
    %35 = vector.multi_reduction <maximumf>, %34, %cst_15 [1] : vector<8x8xf32> to vector<8xf32>
    %36 = vector.shape_cast %35 : vector<8xf32> to vector<8x1xf32>
    %37 = vector.broadcast %36 : vector<8x1xf32> to vector<8x8xf32>
    %38 = arith.subf %34, %37 : vector<8x8xf32>
    %39 = math.exp %38 : vector<8x8xf32>
    %cst_16 = arith.constant dense<0.000000e+00> : vector<8xf32>
    %40 = vector.multi_reduction <add>, %39, %cst_16 [1] : vector<8x8xf32> to vector<8xf32>
    %41 = vector.shape_cast %40 : vector<8xf32> to vector<8x1xf32>
    %42 = math.log %41 : vector<8x1xf32>
    %43 = arith.addf %36, %42 : vector<8x1xf32>
    %44 = arith.subf %43, %32 : vector<8x1xf32>
    %c0_17 = arith.constant 0 : index
    %c0_18 = arith.constant 0 : index
    %45 = vector.load %arg4[%c0_17, %c0_18] : memref<8x1xf32, #tpu.memory_space<vmem>>, vector<8x1xf32>
    tpu.vector_store %arg4[%c0_17, %c0_18], %44 {strides = array<i32>} : memref<8x1xf32, #tpu.memory_space<vmem>>, vector<8x1xf32>,
    return
  }
  func.func @transform_0(%arg0: i32) -> (i32, i32) {
    %c0_i32 = arith.constant 0 : i32
    %c0_i32_0 = arith.constant 0 : i32
    return %arg0, %c0_i32 : i32, i32
  }
  func.func @transform_1(%arg0: i32) -> (i32, i32) {
    %c0_i32 = arith.constant 0 : i32
    %c0_i32_0 = arith.constant 0 : i32
    %c0_i32_1 = arith.constant 0 : i32
    return %c0_i32, %c0_i32_0 : i32, i32
  }
  func.func @transform_2(%arg0: i32) -> (i32, i32) {
    %c0_i32 = arith.constant 0 : i32
    %c0_i32_0 = arith.constant 0 : i32
    return %arg0, %c0_i32 : i32, i32
  }
  func.func @transform_3(%arg0: i32) -> (i32, i32) {
    %c0_i32 = arith.constant 0 : i32
    %c0_i32_0 = arith.constant 0 : i32
    return %arg0, %c0_i32 : i32, i32
  }
}

</mosaic_0001>

<bundles_post_ra>
// kernel: tpu_custom_call.1
= control target key start
LH: loop header
LB: loop body
LE: loop exit
PB: predicated region body
PF: predicated region fallthrough
CT: control target
= control target key end

     0   :  { %8 = vsyncpa [#allocation3], 0  ;;  %s201_s12 = smov [#allocation2]   ;;  %s241_s0 = inlined_call_operand.vmem [shape: f32[8,32], index: 0, kind: input, shape index: {}]   ;;  %s242_s1 = inlined_call_operand.hbm [shape: f32[8,32], index: 1, kind: input, shape index: {}]   ;;  %s243_s2 = inlined_call_operand.vmem [shape: s32[8,1], index: 2, kind: input, shape index: {}]   ;;  %s244_s3 = inlined_call_operand.vmem [shape: f32[8,1], index: 3, kind: output, shape index: {}]  }
   0x1   :  { %s17_s13 = sshll.u32 %s201_s12, 4  ;;  %s18_s13 = int_to_ptr.vmem [resolvable:$true] %s17_s13 }
   0x2   :  { %s187_s14 = scalar_lea.vmem %s18_s13, 128  ;;  %p192_p1 = scmp.lt.s32.totalorder %s18_s13, %s18_s13 }
   0x3   :  { %p188_p0 = scmp.ne.s32.totalorder %s18_s13, %s187_s14  ;;  %p193_p2 = scmp.lt.s32.totalorder %s187_s14, %s187_s14 }
   0x5   :  { %p194_p3 = por %p193_p2, %p192_p1 }
   0x7   :  { %p195_p4 = pnand %p194_p3, %p188_p0 }
   0x9   :  { %198 = shalt.err (!%p195_p4)
}
   0xa   :  { %20 = dma.hbm_to_vmem [thread:$0]  %s242_s1, 128, %s18_s13, [#allocation3]  }
   0xb   :  { %199 = dma.done.wait [#allocation3], 128  }
   0xc   :  { %200 = vsyncadd [#allocation3], 4294967168  ;;  %v27_v0 = vld [vmem:[#allocation2] sm:$0xff]  ;;  %vm30_vm0 = vcmask 261120   ;;  %v202_v6 = vmov 0.0   ;;  %vm203_vm1 = vmmov 0   ;;  %v123_v17 = vlaneseq }
   0xd   :  { %v26_v1 = vld [vmem:[%s241_s0] sm:$0xff]  ;;  %v36_v2 = vmul.f32 %v27_v0, %v27_v0  ;;  %160 = vmatprep.subr.mxu0 %v202_v6  ;;  %162 = vmatprep.mubr.msk.f32.mxu0 %vm203_vm1, %v202_v6  ;;  %v204_v8 = vmov 0   ;;  %vm130_vm3 = vcmask 64512   ;;  %vm148_vm4 = vcmask 7168  }
   0xe   :  { %v29_v3 = vmul.f32 %v26_v1, %v26_v1  ;;  %v28_v7 = vld [vmem:[%s243_s2] sm:$0xff]  ;;  %169 = vset.pattern.permute.xlu1 %v204_v8  ;;  %170 = vset.pattern.permute.xlu0 %v204_v8  ;;  %v124_v19 = vand.u32 127, %v123_v17 }
   0xf   :  { %v37_v4 = vsel %vm30_vm0, %v36_v2, 0.0  ;;  %126 = vperm.xlu1 %169, %v28_v7  }
  0x10   :  { %38 = vadd.xlane.f32.xlu0 %v37_v4  ;;  %v31_v5 = vsel %vm30_vm0, %v29_v3, 0.0 }
  0x14   :  { %32 = vadd.xlane.f32.xlu0 %v31_v5 }
  0x8a   :  { %v127_v21 = vpop.permute.xlu1 %126 }
  0x8b   :  { %vm128_vm2 = vcmp.eq.s32.totalorder %v124_v19, %v127_v21 }
  0x99   :  { %v39_v9 = vpop.xlane.xlu0 %38 }
  0x9a   :  { %v40_v10 = vmax.f32 %v39_v9, 1e-24 }
  0x9c   :  { %171 = vrsqrt.f32 %v40_v10 }
  0x9d   :  { %v33_v11 = vpop.xlane.xlu0 %32 }
  0x9e   :  { %v34_v12 = vmax.f32 %v33_v11, 1e-24 }
  0xa0   :  { %173 = vrsqrt.f32 %v34_v12 }
  0xa9   :  { %v172_v13 = vpop.eup %171 }
  0xaa   :  { %v43_v14 = vmul.f32 %v172_v13, %v27_v0 }
  0xac   :  { %161 = vmatpush3.xpose.msk.msra.mxu0 %vm30_vm0, %v43_v14 }
  0xad   :  { %v174_v15 = vpop.eup %173 }
  0xae   :  { %v42_v16 = vmul.f32 %v174_v15, %v26_v1 }
  0xb0   :  { %163 = vmatmul.mubr.msk.f32.vlgmr.msra.gmra.mxu0 %vm30_vm0, %v42_v16 }
 0x170   :  { %v116_v18 = vpop.f32.mrf.mxu0 }
 0x171   :  { %v120_v20 = vmul.f32 2048.0, %v116_v18 }
 0x172   :  { %v164_v22 = vpop.f32.mrf.mxu0 }
 0x173   :  { %v157_v23 = vadd.f32 -2048.0, %v120_v20 }
 0x175   :  { %v122_v24 = vmin.f32 %v157_v23, 0.0 }
 0x177   :  { %v134_v25 = vsel %vm128_vm2, -inf, %v122_v24  ;;  %v129_v26 = vsel %vm128_vm2, %v122_v24, 0.0 }
 0x178   :  { %v135_v27 = vsel %vm130_vm3, %v134_v25, -inf  ;;  %v131_v33 = vsel %vm130_vm3, %v129_v26, 0.0 }
 0x179   :  { %136 = vmax.xlane.f32.xlu1 %v135_v27 }
 0x202   :  { %v137_v28 = vpop.xlane.xlu1 %136 }
 0x203   :  { %v138_v29 = vsub.f32 %v134_v25, %v137_v28 }
 0x205   :  { %v139_v30 = vmul.f32 1.442695, %v138_v29 }
 0x207   :  { %175 = vpow2.f32 %v139_v30 }
 0x214   :  { %v176_v31 = vpop.eup %175 }
 0x215   :  { %v141_v32 = vsel %vm130_vm3, %v176_v31, 0.0 }
 0x216   :  { %142 = vadd.xlane.f32.xlu0 %v141_v32 }
 0x21a   :  { %132 = vadd.xlane.f32.xlu0 %v131_v33 }
 0x29f   :  { %v143_v34 = vpop.xlane.xlu0 %142 }
 0x2a0   :  { %177 = vlog2.f32 %v143_v34 }
 0x2a3   :  { %v133_v38 = vpop.xlane.xlu0 %132 }
 0x2ad   :  { %v178_v35 = vpop.eup %177 }
 0x2ae   :  { %v145_v36 = vmul.f32 0.6931472, %v178_v35 }
 0x2b0   :  { %v146_v37 = vadd.f32 %v145_v36, %v137_v28 }
 0x2b2   :  { %v147_v39 = vsub.f32 %v146_v37, %v133_v38 }
 0x2b4   :  { %149 = vst.msk [vmem:[%s244_s3] sm:$0xff] %vm148_vm4, %v147_v39 }
 0x2b5   :  { %154 = vsyncpa [#allocation3], 1 }

</bundles_post_ra>
